<compile_context>
chip_gen: v5e
topology: v5e:2x2
jax: 0.10.0
libtpu: 0.0.40
codegen_flags: <defaults>
</compile_context>

<pallas_src>
import jax
import jax.numpy as jnp
from jax.experimental import pallas as pl
from jax.experimental.pallas import tpu as pltpu

LANE = 128   # lane width: every feature axis is zero-padded to a multiple of this
SUB = 16     # bf16-friendly row granule (sublane packing)


def _round_up(x, m):
    return ((x + m - 1) // m) * m


def _vmem_budget_bytes():
    """Per-TensorCore VMEM budget: physical size minus headroom for Mosaic scratch."""
    phys = 64 * 1024 * 1024          # conservative fallback (v7x has 64 MiB / TC)
    try:
        kind = jax.devices()[0].device_kind.lower()
        if any(t in kind for t in ("v5 lite", "v5e", "v5litepod", "v6", "trillium")):
            phys = 128 * 1024 * 1024
    except Exception:
        pass
    return phys - 16 * 1024 * 1024   # never request all of VMEM


# -----------------------------------------------------------------------------
# Kernels
# -----------------------------------------------------------------------------
def _mlp_kernel(x_ref, w1_ref, b1_ref, w2_ref, b2_ref, o_ref):
    """Fused fc1 -> bias -> ReLU -> fc2 -> bias with fully VMEM-resident weights."""
    h = jnp.dot(x_ref[...], w1_ref[...], preferred_element_type=jnp.float32)
    h = jnp.maximum(h + b1_ref[...], 0.0)
    # TODO(synk): dropout omitted (nn.Dropout is identity in eval mode); training-mode
    #             dropout would use pltpu.prng_seed + pltpu.prng_random_bits for a mask.
    out = jnp.dot(h.astype(w2_ref.dtype), w2_ref[...],
                  preferred_element_type=jnp.float32)
    o_ref[...] = (out + b2_ref[...]).astype(o_ref.dtype)


def _mlp_kernel_ktiled(x_ref, w1_ref, b1_ref, w2_ref, b2_ref, o_ref, acc_ref):
    """Same MLP with fc1's contraction (nfeat) tiled over a trailing grid axis."""
    k = pl.program_id(1)

    @pl.when(k == 0)
    def _():
        acc_ref[...] = jnp.zeros_like(acc_ref)

    acc_ref[...] += jnp.dot(x_ref[...], w1_ref[...],
                            preferred_element_type=jnp.float32)

    @pl.when(k == pl.num_programs(1) - 1)
    def _():
        h = jnp.maximum(acc_ref[...] + b1_ref[...], 0.0)
        out = jnp.dot(h.astype(w2_ref.dtype), w2_ref[...],
                      preferred_element_type=jnp.float32)
        o_ref[...] = (out + b2_ref[...]).astype(o_ref.dtype)


# -----------------------------------------------------------------------------
# One-time parameter preparation (hoisted out of the forward pass)
# -----------------------------------------------------------------------------
def prepare_params(w1, b1, w2, b2, compute_dtype=jnp.bfloat16):
    """Pad feature axes to LANE multiples and cast weights to the MXU dtype. Run once."""
    nfeat, nhid = w1.shape
    nclass = w2.shape[1]
    nfeat_p = _round_up(nfeat, LANE)
    nhid_p = _round_up(nhid, LANE)
    nclass_p = _round_up(nclass, LANE)
    w1_p = jnp.zeros((nfeat_p, nhid_p), compute_dtype).at[:nfeat, :nhid].set(
        w1.astype(compute_dtype))
    b1_p = jnp.zeros((1, nhid_p), jnp.float32).at[:, :nhid].set(
        jnp.reshape(b1, (1, -1)).astype(jnp.float32))
    w2_p = jnp.zeros((nhid_p, nclass_p), compute_dtype).at[:nhid, :nclass].set(
        w2.astype(compute_dtype))
    b2_p = jnp.zeros((1, nclass_p), jnp.float32).at[:, :nclass].set(
        jnp.reshape(b2, (1, -1)).astype(jnp.float32))
    return w1_p, b1_p, w2_p, b2_p


# -----------------------------------------------------------------------------
# Forward pass
# -----------------------------------------------------------------------------
def mlp_forward(x, w1_p, b1_p, w2_p, b2_p, *, nclass, tile_m=None,
                force_ktiled=False):
    """x: (N, nfeat). w*_p / b*_p come from prepare_params. Returns (N, nclass)."""
    compute_dtype = w1_p.dtype
    N, nfeat = x.shape
    nfeat_p, nhid_p = w1_p.shape
    nclass_p = w2_p.shape[1]
    assert nfeat <= nfeat_p, "x features exceed padded weight; re-run prepare_params"

    out_dtype = compute_dtype                      # bf16 store halves the padded write
    w_isz = jnp.dtype(compute_dtype).itemsize
    out_isz = jnp.dtype(out_dtype).itemsize

    budget = _vmem_budget_bytes()

    # Footprint math is conservative (assumes double-buffered weights); Buffered(1)
    # on the constant-index blocks then just adds headroom.
    w_only = (nfeat_p * nhid_p + nhid_p * nclass_p) * w_isz + (nhid_p + nclass_p) * 4
    use_ktiled = bool(force_ktiled) or (2 * w_only > (budget * 2) // 3)

    if use_ktiled:
        # Largest K tile (multiple of 128, <= 1024) that divides nfeat_p exactly so
        # the zero-padded feature axis is never read past its end.
        tile_k = LANE
        for cand in range(min(1024, nfeat_p), 0, -LANE):
            if nfeat_p % cand == 0:
                tile_k = cand
                break
        resident = (2 * (nhid_p * nclass_p * w_isz + (nhid_p + nclass_p) * 4)
                    + 2 * tile_k * nhid_p * w_isz)           # streamed w1 K-blocks
        per_row = 2 * tile_k * w_isz + 2 * nclass_p * out_isz + 2 * nhid_p * 4
    else:
        tile_k = nfeat_p
        resident = 2 * w_only
        per_row = 2 * nfeat_p * w_isz + 2 * nclass_p * out_isz \
                  + nhid_p * 4 + nclass_p * 4

    if tile_m is None:
        fit = int((budget - resident) // max(per_row, 1))
        tile_m = max(SUB, min(fit, 2048))
    tile_m = _round_up(max(SUB, min(int(tile_m), _round_up(N, SUB))), SUB)

    # Per-call activation prep: only the feature axis needs zero padding (and the
    # row axis up to the 16-row sublane granule); no padding up to tile_m.
    n_pad = _round_up(N, SUB)
    if nfeat == nfeat_p and N == n_pad:
        x_p = x.astype(compute_dtype)
    else:
        x_p = jnp.zeros((n_pad, nfeat_p), compute_dtype).at[:N, :nfeat].set(
            x.astype(compute_dtype))

    grid_m = pl.cdiv(n_pad, tile_m)
    grid_k = nfeat_p // tile_k

    need = resident + tile_m * per_row
    vmem_limit = None
    if need > 24 * 1024 * 1024:
        vmem_limit = int(min(budget, (need * 3) // 2 + (2 << 20)))

    flops = 2 * n_pad * (nfeat_p * nhid_p + nhid_p * nclass_p)
    bytes_accessed = (n_pad * nfeat_p * w_isz
                      + nfeat_p * nhid_p * w_isz * (grid_m if use_ktiled else 1)
                      + nhid_p * nclass_p * w_isz
                      + (nhid_p + nclass_p) * 4
                      + n_pad * nclass_p * out_isz)

    def build_and_call(single_buffer_weights):
        res_kw = {"pipeline_mode": pl.Buffered(1)} if single_buffer_weights else {}
        if use_ktiled:
            grid = (grid_m, grid_k)
            in_specs = [
                pl.BlockSpec((tile_m, tile_k), lambda i, k: (i, k)),           # x
                pl.BlockSpec((tile_k, nhid_p), lambda i, k: (k, 0)),           # w1 (streamed)
                pl.BlockSpec((1, nhid_p), lambda i, k: (0, 0), **res_kw),      # b1
                pl.BlockSpec((nhid_p, nclass_p), lambda i, k: (0, 0), **res_kw),  # w2
                pl.BlockSpec((1, nclass_p), lambda i, k: (0, 0), **res_kw),    # b2
            ]
            out_spec = pl.BlockSpec((tile_m, nclass_p), lambda i, k: (i, 0))
            scratch = [pltpu.VMEM((tile_m, nhid_p), jnp.float32)]
            kernel = _mlp_kernel_ktiled
            dims = ("parallel", "arbitrary")
        else:
            grid = (grid_m,)
            in_specs = [
                pl.BlockSpec((tile_m, nfeat_p), lambda i: (i, 0)),             # x (row-tiled)
                pl.BlockSpec((nfeat_p, nhid_p), lambda i: (0, 0), **res_kw),   # w1 resident
                pl.BlockSpec((1, nhid_p), lambda i: (0, 0), **res_kw),         # b1
                pl.BlockSpec((nhid_p, nclass_p), lambda i: (0, 0), **res_kw),  # w2 resident
                pl.BlockSpec((1, nclass_p), lambda i: (0, 0), **res_kw),       # b2
            ]
            out_spec = pl.BlockSpec((tile_m, nclass_p), lambda i: (i, 0))
            scratch = []
            kernel = _mlp_kernel
            dims = ("parallel",)

        return pl.pallas_call(
            kernel,
            out_shape=jax.ShapeDtypeStruct((n_pad, nclass_p), out_dtype),
            grid=grid,
            in_specs=in_specs,
            out_specs=out_spec,
            scratch_shapes=scratch,
            compiler_params=pltpu.CompilerParams(
                dimension_semantics=dims,
                vmem_limit_bytes=vmem_limit),
            cost_estimate=pl.CostEstimate(
                flops=int(flops), transcendentals=0,
                bytes_accessed=int(bytes_accessed)),
        )(x_p, w1_p, b1_p, w2_p, b2_p)

    try:
        out_p = build_and_call(single_buffer_weights=True)
    except Exception:
        # pl.Buffered(1) not supported on this jax build -> default double buffering.
        out_p = build_and_call(single_buffer_weights=False)

    return out_p[:N, :nclass].astype(x.dtype)


# -----------------------------------------------------------------------------
# Param init mimicking nn.Linear's U(-1/sqrt(fan_in), 1/sqrt(fan_in))
# -----------------------------------------------------------------------------
def init_params(key, nfeat, nhid, nclass, dtype=jnp.float32):
    k1, k2, k3, k4 = jax.random.split(key, 4)
    bound1 = 1.0 / (nfeat ** 0.5)
    bound2 = 1.0 / (nhid ** 0.5)
    w1 = jax.random.uniform(k1, (nfeat, nhid), dtype, -bound1, bound1)
    b1 = jax.random.uniform(k2, (1, nhid), dtype, -bound1, bound1)
    w2 = jax.random.uniform(k3, (nhid, nclass), dtype, -bound2, bound2)
    b2 = jax.random.uniform(k4, (1, nclass), dtype, -bound2, bound2)
    return w1, b1, w2, b2


if __name__ == "__main__":
    key = jax.random.PRNGKey(0)
    kx, kp = jax.random.split(key)

    N, nfeat, nhid, nclass = 8, 16, 32, 4
    x = jax.random.normal(kx, (N, nfeat), jnp.float32)
    w1, b1, w2, b2 = init_params(kp, nfeat, nhid, nclass)

    # One-time parameter prep (padding + bf16 cast hoisted out of the forward).
    w1_p, b1_p, w2_p, b2_p = prepare_params(w1, b1, w2, b2)

    # Resident-weight path.
    out = mlp_forward(x, w1_p, b1_p, w2_p, b2_p, nclass=nclass)
    out = jax.block_until_ready(out)

    # Also exercise the K-tiled fallback path (used for very wide feature dims).
    out_kt = mlp_forward(x, w1_p, b1_p, w2_p, b2_p, nclass=nclass,
                         force_ktiled=True)
    out_kt = jax.block_until_ready(out_kt)

    # Reference in plain JAX (dropout = identity in eval mode). Tolerance reflects
    # bf16 inputs / hidden activation / stored output (f32 accumulation on the MXU).
    ref = jnp.maximum(x @ w1 + b1, 0.0) @ w2 + b2
    assert out.shape == (N, nclass)
    assert out_kt.shape == (N, nclass)
    assert jnp.allclose(out, ref, atol=5e-2, rtol=5e-2), (
        f"resident path max abs err {jnp.max(jnp.abs(out - ref))}")
    assert jnp.allclose(out_kt, ref, atol=5e-2, rtol=5e-2), (
        f"k-tiled path max abs err {jnp.max(jnp.abs(out_kt - ref))}")

    print("KERNEL_OK")
</pallas_src>

<mosaic_0001>
module attributes {stable_mosaic.version = 11 : i64} {
  func.func @_mlp_kernel(%arg0: i32, %arg1: memref<16x128xbf16, #tpu.memory_space<vmem>>, %arg2: memref<128x128xbf16, #tpu.memory_space<vmem>>, %arg3: memref<1x128xf32, #tpu.memory_space<vmem>>, %arg4: memref<128x128xbf16, #tpu.memory_space<vmem>>, %arg5: memref<1x128xf32, #tpu.memory_space<vmem>>, %arg6: memref<16x128xbf16, #tpu.memory_space<vmem>>) attributes {dimension_semantics = [#tpu.dimension_semantics<parallel>], iteration_bounds = array<i64: 1>, scalar_prefetch = 0 : i64, scratch_operands = 0 : i64, tpu.core_type = #tpu.core_type<tc>, window_params = [{transform_indices = @transform_0, window_bounds = array<i64: 16, 128>}, {pipeline_mode = #tpu.pipeline_mode<synchronous>, transform_indices = @transform_1, window_bounds = array<i64: 128, 128>}, {pipeline_mode = #tpu.pipeline_mode<synchronous>, transform_indices = @transform_2, window_bounds = array<i64: 1, 128>}, {pipeline_mode = #tpu.pipeline_mode<synchronous>, transform_indices = @transform_3, window_bounds = array<i64: 128, 128>}, {pipeline_mode = #tpu.pipeline_mode<synchronous>, transform_indices = @transform_4, window_bounds = array<i64: 1, 128>}, {transform_indices = @transform_5, window_bounds = array<i64: 16, 128>}]} {
    %c0 = arith.constant 0 : index
    %c0_0 = arith.constant 0 : index
    %0 = vector.load %arg1[%c0, %c0_0] : memref<16x128xbf16, #tpu.memory_space<vmem>>, vector<16x128xbf16>
    %c0_1 = arith.constant 0 : index
    %c0_2 = arith.constant 0 : index
    %1 = vector.load %arg2[%c0_1, %c0_2] : memref<128x128xbf16, #tpu.memory_space<vmem>>, vector<128x128xbf16>
    %cst = arith.constant dense<0.000000e+00> : vector<16x128xf32>
    %2 = tpu.matmul %0, %1, %cst {dimension_numbers = #tpu.dot_dimension_numbers<[1], [0], [0], [1], [0, 0, 1, 1], [], []>} : vector<16x128xbf16>, vector<128x128xbf16>, vector<16x128xf32> -> vector<16x128xf32>
    %c0_3 = arith.constant 0 : index
    %c0_4 = arith.constant 0 : index
    %3 = vector.load %arg3[%c0_3, %c0_4] : memref<1x128xf32, #tpu.memory_space<vmem>>, vector<1x128xf32>
    %4 = vector.broadcast %3 : vector<1x128xf32> to vector<16x128xf32>
    %5 = arith.addf %2, %4 : vector<16x128xf32>
    %cst_5 = arith.constant 0.000000e+00 : f32
    %6 = vector.broadcast %cst_5 : f32 to vector<16x128xf32>
    %7 = arith.maximumf %5, %6 : vector<16x128xf32>
    %8 = arith.truncf %7 : vector<16x128xf32> to vector<16x128xbf16>
    %c0_6 = arith.constant 0 : index
    %c0_7 = arith.constant 0 : index
    %9 = vector.load %arg4[%c0_6, %c0_7] : memref<128x128xbf16, #tpu.memory_space<vmem>>, vector<128x128xbf16>
    %cst_8 = arith.constant dense<0.000000e+00> : vector<16x128xf32>
    %10 = tpu.matmul %8, %9, %cst_8 {dimension_numbers = #tpu.dot_dimension_numbers<[1], [0], [0], [1], [0, 0, 1, 1], [], []>} : vector<16x128xbf16>, vector<128x128xbf16>, vector<16x128xf32> -> vector<16x128xf32>
    %c0_9 = arith.constant 0 : index
    %c0_10 = arith.constant 0 : index
    %11 = vector.load %arg5[%c0_9, %c0_10] : memref<1x128xf32, #tpu.memory_space<vmem>>, vector<1x128xf32>
    %12 = vector.broadcast %11 : vector<1x128xf32> to vector<16x128xf32>
    %13 = arith.addf %10, %12 : vector<16x128xf32>
    %14 = arith.truncf %13 : vector<16x128xf32> to vector<16x128xbf16>
    %c0_11 = arith.constant 0 : index
    %c0_12 = arith.constant 0 : index
    %15 = vector.load %arg6[%c0_11, %c0_12] : memref<16x128xbf16, #tpu.memory_space<vmem>>, vector<16x128xbf16>
    tpu.vector_store %arg6[%c0_11, %c0_12], %14 {strides = array<i32>} : memref<16x128xbf16, #tpu.memory_space<vmem>>, vector<16x128xbf16>,
    return
  }
  func.func @transform_0(%arg0: i32) -> (i32, i32) {
    %c0_i32 = arith.constant 0 : i32
    %c0_i32_0 = arith.constant 0 : i32
    return %arg0, %c0_i32 : i32, i32
  }
  func.func @transform_1(%arg0: i32) -> (i32, i32) {
    %c0_i32 = arith.constant 0 : i32
    %c0_i32_0 = arith.constant 0 : i32
    %c0_i32_1 = arith.constant 0 : i32
    return %c0_i32, %c0_i32_0 : i32, i32
  }
  func.func @transform_2(%arg0: i32) -> (i32, i32) {
    %c0_i32 = arith.constant 0 : i32
    %c0_i32_0 = arith.constant 0 : i32
    %c0_i32_1 = arith.constant 0 : i32
    return %c0_i32, %c0_i32_0 : i32, i32
  }
  func.func @transform_3(%arg0: i32) -> (i32, i32) {
    %c0_i32 = arith.constant 0 : i32
    %c0_i32_0 = arith.constant 0 : i32
    %c0_i32_1 = arith.constant 0 : i32
    return %c0_i32, %c0_i32_0 : i32, i32
  }
  func.func @transform_4(%arg0: i32) -> (i32, i32) {
    %c0_i32 = arith.constant 0 : i32
    %c0_i32_0 = arith.constant 0 : i32
    %c0_i32_1 = arith.constant 0 : i32
    return %c0_i32, %c0_i32_0 : i32, i32
  }
  func.func @transform_5(%arg0: i32) -> (i32, i32) {
    %c0_i32 = arith.constant 0 : i32
    %c0_i32_0 = arith.constant 0 : i32
    return %arg0, %c0_i32 : i32, i32
  }
}

module attributes {stable_mosaic.version = 11 : i64} {
  func.func @_mlp_kernel(%arg0: i32, %arg1: memref<16x128xbf16, #tpu.memory_space<vmem>>, %arg2: memref<128x128xbf16, #tpu.memory_space<vmem>>, %arg3: memref<1x128xf32, #tpu.memory_space<vmem>>, %arg4: memref<128x128xbf16, #tpu.memory_space<vmem>>, %arg5: memref<1x128xf32, #tpu.memory_space<vmem>>, %arg6: memref<16x128xbf16, #tpu.memory_space<vmem>>) attributes {dimension_semantics = [#tpu.dimension_semantics<parallel>], iteration_bounds = array<i64: 1>, scalar_prefetch = 0 : i64, scratch_operands = 0 : i64, tpu.core_type = #tpu.core_type<tc>, window_params = [{transform_indices = @transform_0, window_bounds = array<i64: 16, 128>}, {pipeline_mode = #tpu.pipeline_mode<synchronous>, transform_indices = @transform_1, window_bounds = array<i64: 128, 128>}, {pipeline_mode = #tpu.pipeline_mode<synchronous>, transform_indices = @transform_2, window_bounds = array<i64: 1, 128>}, {pipeline_mode = #tpu.pipeline_mode<synchronous>, transform_indices = @transform_3, window_bounds = array<i64: 128, 128>}, {pipeline_mode = #tpu.pipeline_mode<synchronous>, transform_indices = @transform_4, window_bounds = array<i64: 1, 128>}, {transform_indices = @transform_5, window_bounds = array<i64: 16, 128>}]} {
    %c0 = arith.constant 0 : index
    %c0_0 = arith.constant 0 : index
    %0 = vector.load %arg1[%c0, %c0_0] : memref<16x128xbf16, #tpu.memory_space<vmem>>, vector<16x128xbf16>
    %c0_1 = arith.constant 0 : index
    %c0_2 = arith.constant 0 : index
    %1 = vector.load %arg2[%c0_1, %c0_2] : memref<128x128xbf16, #tpu.memory_space<vmem>>, vector<128x128xbf16>
    %cst = arith.constant dense<0.000000e+00> : vector<16x128xf32>
    %2 = tpu.matmul %0, %1, %cst {dimension_numbers = #tpu.dot_dimension_numbers<[1], [0], [0], [1], [0, 0, 1, 1], [], []>} : vector<16x128xbf16>, vector<128x128xbf16>, vector<16x128xf32> -> vector<16x128xf32>
    %c0_3 = arith.constant 0 : index
    %c0_4 = arith.constant 0 : index
    %3 = vector.load %arg3[%c0_3, %c0_4] : memref<1x128xf32, #tpu.memory_space<vmem>>, vector<1x128xf32>
    %4 = vector.broadcast %3 : vector<1x128xf32> to vector<16x128xf32>
    %5 = arith.addf %2, %4 : vector<16x128xf32>
    %cst_5 = arith.constant 0.000000e+00 : f32
    %6 = vector.broadcast %cst_5 : f32 to vector<16x128xf32>
    %7 = arith.maximumf %5, %6 : vector<16x128xf32>
    %8 = arith.truncf %7 : vector<16x128xf32> to vector<16x128xbf16>
    %c0_6 = arith.constant 0 : index
    %c0_7 = arith.constant 0 : index
    %9 = vector.load %arg4[%c0_6, %c0_7] : memref<128x128xbf16, #tpu.memory_space<vmem>>, vector<128x128xbf16>
    %cst_8 = arith.constant dense<0.000000e+00> : vector<16x128xf32>
    %10 = tpu.matmul %8, %9, %cst_8 {dimension_numbers = #tpu.dot_dimension_numbers<[1], [0], [0], [1], [0, 0, 1, 1], [], []>} : vector<16x128xbf16>, vector<128x128xbf16>, vector<16x128xf32> -> vector<16x128xf32>
    %c0_9 = arith.constant 0 : index
    %c0_10 = arith.constant 0 : index
    %11 = vector.load %arg5[%c0_9, %c0_10] : memref<1x128xf32, #tpu.memory_space<vmem>>, vector<1x128xf32>
    %12 = vector.broadcast %11 : vector<1x128xf32> to vector<16x128xf32>
    %13 = arith.addf %10, %12 : vector<16x128xf32>
    %14 = arith.truncf %13 : vector<16x128xf32> to vector<16x128xbf16>
    %c0_11 = arith.constant 0 : index
    %c0_12 = arith.constant 0 : index
    %15 = vector.load %arg6[%c0_11, %c0_12] : memref<16x128xbf16, #tpu.memory_space<vmem>>, vector<16x128xbf16>
    tpu.vector_store %arg6[%c0_11, %c0_12], %14 {strides = array<i32>} : memref<16x128xbf16, #tpu.memory_space<vmem>>, vector<16x128xbf16>,
    return
  }
  func.func @transform_0(%arg0: i32) -> (i32, i32) {
    %c0_i32 = arith.constant 0 : i32
    %c0_i32_0 = arith.constant 0 : i32
    return %arg0, %c0_i32 : i32, i32
  }
  func.func @transform_1(%arg0: i32) -> (i32, i32) {
    %c0_i32 = arith.constant 0 : i32
    %c0_i32_0 = arith.constant 0 : i32
    %c0_i32_1 = arith.constant 0 : i32
    return %c0_i32, %c0_i32_0 : i32, i32
  }
  func.func @transform_2(%arg0: i32) -> (i32, i32) {
    %c0_i32 = arith.constant 0 : i32
    %c0_i32_0 = arith.constant 0 : i32
    %c0_i32_1 = arith.constant 0 : i32
    return %c0_i32, %c0_i32_0 : i32, i32
  }
  func.func @transform_3(%arg0: i32) -> (i32, i32) {
    %c0_i32 = arith.constant 0 : i32
    %c0_i32_0 = arith.constant 0 : i32
    %c0_i32_1 = arith.constant 0 : i32
    return %c0_i32, %c0_i32_0 : i32, i32
  }
  func.func @transform_4(%arg0: i32) -> (i32, i32) {
    %c0_i32 = arith.constant 0 : i32
    %c0_i32_0 = arith.constant 0 : i32
    %c0_i32_1 = arith.constant 0 : i32
    return %c0_i32, %c0_i32_0 : i32, i32
  }
  func.func @transform_5(%arg0: i32) -> (i32, i32) {
    %c0_i32 = arith.constant 0 : i32
    %c0_i32_0 = arith.constant 0 : i32
    return %arg0, %c0_i32 : i32, i32
  }
}

</mosaic_0001>

<bundles_post_ra>
// kernel: tpu_custom_call.1
= control target key start
LH: loop header
LB: loop body
LE: loop exit
PB: predicated region body
PF: predicated region fallthrough
CT: control target
= control target key end

     0   :  { %10 = vsyncpa [#allocation3], 0  ;;  %s533_s0 = inlined_call_operand.hbm [shape: bf16[16,128], index: 0, kind: input, shape index: {}]   ;;  %s534_s1 = inlined_call_operand.hbm [shape: bf16[128,128], index: 1, kind: input, shape index: {}]   ;;  %s535_s2 = inlined_call_operand.vmem [shape: f32[1,128], index: 2, kind: input, shape index: {}]   ;;  %s536_s3 = inlined_call_operand.hbm [shape: bf16[128,128], index: 3, kind: input, shape index: {}]   ;;  %s537_s4 = inlined_call_operand.vmem [shape: f32[1,128], index: 4, kind: input, shape index: {}]   ;;  %s538_s5 = inlined_call_operand.hbm [shape: bf16[16,128], index: 5, kind: output, shape index: {}]  }
   0x1   :  { %11 = vsyncpa [#allocation6], 0 }
   0x2   :  { %12 = vsyncpa [#allocation4], 0  ;;  %s30_s20 = sshll.u32 %s534_s1, 4  ;;  %s467_s21 = smov [#allocation5]   ;;  %s31_s20 = int_to_ptr.hbm [resolvable:$true] %s30_s20 }
   0x3   :  { %s32_s22 = sshll.u32 %s467_s21, 4  ;;  %s17_s25 = sshll.u32 %s533_s0, 4  ;;  %s33_s22 = int_to_ptr.vmem [resolvable:$true] %s32_s22  ;;  %s18_s25 = int_to_ptr.hbm [resolvable:$true] %s17_s25 }
   0x4   :  { %s468_s26 = smov 64   ;;  %s469_s27 = smov 4  }
   0x5   :  { %38 = dma.hbm_to_vmem [thread:$0]  %s31_s20, 1024, %s33_s22, [#allocation6], %s468_s26, %s468_s26, %s469_s27  }
   0x6   :  { %s470_s28 = smov [#allocation2]   ;;  %s45_s1 = sshll.u32 %s536_s3, 4  ;;  %s46_s1 = int_to_ptr.hbm [resolvable:$true] %s45_s1 }
   0x7   :  { %s19_s29 = sshll.u32 %s470_s28, 4  ;;  %s471_s0 = smov [#allocation7]   ;;  %s20_s29 = int_to_ptr.vmem [resolvable:$true] %s19_s29 }
   0x8   :  { %25 = dma.hbm_to_vmem [thread:$0]  %s18_s25, 128, %s20_s29, [#allocation3], %s468_s26, %s468_s26, %s469_s27  }
   0x9   :  { %s47_s7 = sshll.u32 %s471_s0, 4  ;;  %s48_s7 = int_to_ptr.vmem [resolvable:$true] %s47_s7 }
   0xa   :  { %53 = dma.hbm_to_vmem [thread:$0]  %s46_s1, 1024, %s48_s7, [#allocation6], %s468_s26, %s468_s26, %s469_s27  }
   0xb   :  { %461 = dma.done.wait [#allocation3], 128  }
   0xc   :  { %462 = vsyncadd [#allocation3], 4294967168 }
   0xd   :  { %463 = dma.done.wait [#allocation6], 2048  }
   0xe   :  { %464 = vsyncadd [#allocation6], 4294965248  ;;  %v343_v0 = vld [vmem:[#allocation5 + $0x38] sm:$0xff]  ;;  %v342_v1 = vld [vmem:[#allocation5 + $0x30] sm:$0xff]  ;;  %s472_s11 = smov [#allocation8]   ;;  %s253_s15 = sshll.u32 %s538_s5, 4  ;;  %s254_s15 = int_to_ptr.hbm [resolvable:$true] %s253_s15 }
   0xf   :  { %144 = vmatpush.bf16.msra.mxu0 %v343_v0  ;;  %v351_v2 = vld [vmem:[#allocation7 + $0x38] sm:$0xff]  ;;  %v350_v3 = vld [vmem:[#allocation7 + $0x30] sm:$0xff]  ;;  %v341_v4 = vld [vmem:[#allocation5 + $0x28] sm:$0xff]  ;;  %s251_s12 = sshll.u32 %s472_s11, 4  ;;  %s252_s12 = int_to_ptr.vmem [resolvable:$true] %s251_s12 }
  0x10   :  { %229 = vmatpush.bf16.msra.mxu1 %v351_v2  ;;  %v349_v5 = vld [vmem:[#allocation7 + $0x28] sm:$0xff]  ;;  %v340_v6 = vld [vmem:[#allocation5 + $0x20] sm:$0xff]  ;;  %v339_v8 = vld [vmem:[#allocation5 + $0x18] sm:$0xff] }
  0x11   :  { %v348_v7 = vld [vmem:[#allocation7 + $0x20] sm:$0xff]  ;;  %v338_v9 = vld [vmem:[#allocation5 + $0x10] sm:$0xff]  ;;  %v337_v10 = vld [vmem:[#allocation5 + $0x8] sm:$0xff] }
  0x12   :  { %v336_v11 = vld [vmem:[#allocation5] sm:$0xff]  ;;  %v335_v12 = vld [vmem:[#allocation2] sm:$0xff]  ;;  %v346_v14 = vld [vmem:[#allocation7 + $0x10] sm:$0xff] }
  0x13   :  { %145 = vmatpush.bf16.msra.mxu0 %v342_v1  ;;  %v347_v13 = vld [vmem:[#allocation7 + $0x18] sm:$0xff]  ;;  %v345_v15 = vld [vmem:[#allocation7 + $0x8] sm:$0xff]  ;;  %v344_v16 = vld [vmem:[#allocation7] sm:$0xff] }
  0x14   :  { %230 = vmatpush.bf16.msra.mxu1 %v350_v3  ;;  %v363_v18 = vld [vmem:[%s535_s2] ss:$0 sm:$0xff] }
  0x15   :  { %v364_v26 = vld [vmem:[%s537_s4] ss:$0 sm:$0xff] }
  0x17   :  { %146 = vmatpush.bf16.msra.mxu0 %v341_v4 }
  0x18   :  { %231 = vmatpush.bf16.msra.mxu1 %v349_v5 }
  0x1b   :  { %147 = vmatpush.bf16.msra.mxu0 %v340_v6 }
  0x1c   :  { %232 = vmatpush.bf16.msra.mxu1 %v348_v7 }
  0x1f   :  { %148 = vmatpush.bf16.msra.mxu0 %v339_v8 }
  0x20   :  { %233 = vmatpush.bf16.msra.mxu1 %v347_v13 }
  0x23   :  { %149 = vmatpush.bf16.msra.mxu0 %v338_v9 }
  0x24   :  { %234 = vmatpush.bf16.msra.mxu1 %v346_v14 }
  0x27   :  { %150 = vmatpush.bf16.msra.mxu0 %v337_v10 }
  0x28   :  { %235 = vmatpush.bf16.msra.mxu1 %v345_v15 }
  0x2b   :  { %151 = vmatpush.bf16.msra.mxu0 %v336_v11 }
  0x2c   :  { %236 = vmatpush.bf16.msra.mxu1 %v344_v16 }
  0x2e   :  { %152 = vmatmul.bf16.vlgmr.msra.gmra.mxu0 %v335_v12 }
  0xab   :  { %v153_v17 = vpop.f32.mrf.mxu0 }
  0xac   :  { %v154_v19 = vadd.f32 %v363_v18, %v153_v17 }
  0xae   :  { %v158_v22 = vmax.f32 %v154_v19, 0.0 }
  0xb3   :  { %v155_v20 = vpop.f32.mrf.mxu0 }
  0xb4   :  { %v156_v21 = vadd.f32 %v363_v18, %v155_v20 }
  0xb6   :  { %v159_v23 = vmax.f32 %v156_v21, 0.0 }
  0xb8   :  { %v160_v24 = vpack.c.bf16 %v159_v23, %v158_v22 }
  0xba   :  { %237 = vmatmul.bf16.vlgmr.msra.gmra.mxu1 %v160_v24 }
 0x137   :  { %v238_v25 = vpop.f32.mrf.mxu1 }
 0x138   :  { %v239_v28 = vadd.f32 %v364_v26, %v238_v25 }
 0x13f   :  { %v240_v27 = vpop.f32.mrf.mxu1 }
 0x140   :  { %v241_v29 = vadd.f32 %v364_v26, %v240_v27 }
 0x142   :  { %v355_v30 = vpack.c.bf16 %v241_v29, %v239_v28 }
 0x144   :  { %356 = vst [vmem:[#allocation8] sm:$0xff] %v355_v30  }
 0x145   :  { %259 = dma.vmem_to_hbm [thread:$0]  %s252_s12, 128, %s254_s15, [#allocation4], %s468_s26, %s468_s26, %s469_s27  }
 0x146   :  { %465 = dma.done.wait [#allocation4], 128  }
 0x147   :  { %466 = vsyncadd [#allocation4], 4294967168 }
 0x148   :  { %264 = vsyncpa [#allocation3], 1 }
 0x149   :  { %265 = vsyncpa [#allocation6], 1 }
 0x14a   :  { %266 = vsyncpa [#allocation4], 1 }

// kernel: tpu_custom_call.1
= control target key start
LH: loop header
LB: loop body
LE: loop exit
PB: predicated region body
PF: predicated region fallthrough
CT: control target
= control target key end

     0   :  { %10 = vsyncpa [#allocation3], 0  ;;  %s533_s0 = inlined_call_operand.hbm [shape: bf16[16,128], index: 0, kind: input, shape index: {}]   ;;  %s534_s1 = inlined_call_operand.hbm [shape: bf16[128,128], index: 1, kind: input, shape index: {}]   ;;  %s535_s2 = inlined_call_operand.vmem [shape: f32[1,128], index: 2, kind: input, shape index: {}]   ;;  %s536_s3 = inlined_call_operand.hbm [shape: bf16[128,128], index: 3, kind: input, shape index: {}]   ;;  %s537_s4 = inlined_call_operand.vmem [shape: f32[1,128], index: 4, kind: input, shape index: {}]   ;;  %s538_s5 = inlined_call_operand.hbm [shape: bf16[16,128], index: 5, kind: output, shape index: {}]  }
   0x1   :  { %11 = vsyncpa [#allocation6], 0 }
   0x2   :  { %12 = vsyncpa [#allocation4], 0  ;;  %s30_s20 = sshll.u32 %s534_s1, 4  ;;  %s467_s21 = smov [#allocation5]   ;;  %s31_s20 = int_to_ptr.hbm [resolvable:$true] %s30_s20 }
   0x3   :  { %s32_s22 = sshll.u32 %s467_s21, 4  ;;  %s17_s25 = sshll.u32 %s533_s0, 4  ;;  %s33_s22 = int_to_ptr.vmem [resolvable:$true] %s32_s22  ;;  %s18_s25 = int_to_ptr.hbm [resolvable:$true] %s17_s25 }
   0x4   :  { %s468_s26 = smov 64   ;;  %s469_s27 = smov 4  }
   0x5   :  { %38 = dma.hbm_to_vmem [thread:$0]  %s31_s20, 1024, %s33_s22, [#allocation6], %s468_s26, %s468_s26, %s469_s27  }
   0x6   :  { %s470_s28 = smov [#allocation2]   ;;  %s45_s1 = sshll.u32 %s536_s3, 4  ;;  %s46_s1 = int_to_ptr.hbm [resolvable:$true] %s45_s1 }
   0x7   :  { %s19_s29 = sshll.u32 %s470_s28, 4  ;;  %s471_s0 = smov [#allocation7]   ;;  %s20_s29 = int_to_ptr.vmem [resolvable:$true] %s19_s29 }
   0x8   :  { %25 = dma.hbm_to_vmem [thread:$0]  %s18_s25, 128, %s20_s29, [#allocation3], %s468_s26, %s468_s26, %s469_s27  }
   0x9   :  { %s47_s7 = sshll.u32 %s471_s0, 4  ;;  %s48_s7 = int_to_ptr.vmem [resolvable:$true] %s47_s7 }
   0xa   :  { %53 = dma.hbm_to_vmem [thread:$0]  %s46_s1, 1024, %s48_s7, [#allocation6], %s468_s26, %s468_s26, %s469_s27  }
   0xb   :  { %461 = dma.done.wait [#allocation3], 128  }
   0xc   :  { %462 = vsyncadd [#allocation3], 4294967168 }
   0xd   :  { %463 = dma.done.wait [#allocation6], 2048  }
   0xe   :  { %464 = vsyncadd [#allocation6], 4294965248  ;;  %v343_v0 = vld [vmem:[#allocation5 + $0x38] sm:$0xff]  ;;  %v342_v1 = vld [vmem:[#allocation5 + $0x30] sm:$0xff]  ;;  %s472_s11 = smov [#allocation8]   ;;  %s253_s15 = sshll.u32 %s538_s5, 4  ;;  %s254_s15 = int_to_ptr.hbm [resolvable:$true] %s253_s15 }
   0xf   :  { %144 = vmatpush.bf16.msra.mxu0 %v343_v0  ;;  %v351_v2 = vld [vmem:[#allocation7 + $0x38] sm:$0xff]  ;;  %v350_v3 = vld [vmem:[#allocation7 + $0x30] sm:$0xff]  ;;  %v341_v4 = vld [vmem:[#allocation5 + $0x28] sm:$0xff]  ;;  %s251_s12 = sshll.u32 %s472_s11, 4  ;;  %s252_s12 = int_to_ptr.vmem [resolvable:$true] %s251_s12 }
  0x10   :  { %229 = vmatpush.bf16.msra.mxu1 %v351_v2  ;;  %v349_v5 = vld [vmem:[#allocation7 + $0x28] sm:$0xff]  ;;  %v340_v6 = vld [vmem:[#allocation5 + $0x20] sm:$0xff]  ;;  %v339_v8 = vld [vmem:[#allocation5 + $0x18] sm:$0xff] }
  0x11   :  { %v348_v7 = vld [vmem:[#allocation7 + $0x20] sm:$0xff]  ;;  %v338_v9 = vld [vmem:[#allocation5 + $0x10] sm:$0xff]  ;;  %v337_v10 = vld [vmem:[#allocation5 + $0x8] sm:$0xff] }
  0x12   :  { %v336_v11 = vld [vmem:[#allocation5] sm:$0xff]  ;;  %v335_v12 = vld [vmem:[#allocation2] sm:$0xff]  ;;  %v346_v14 = vld [vmem:[#allocation7 + $0x10] sm:$0xff] }
  0x13   :  { %145 = vmatpush.bf16.msra.mxu0 %v342_v1  ;;  %v347_v13 = vld [vmem:[#allocation7 + $0x18] sm:$0xff]  ;;  %v345_v15 = vld [vmem:[#allocation7 + $0x8] sm:$0xff]  ;;  %v344_v16 = vld [vmem:[#allocation7] sm:$0xff] }
  0x14   :  { %230 = vmatpush.bf16.msra.mxu1 %v350_v3  ;;  %v363_v18 = vld [vmem:[%s535_s2] ss:$0 sm:$0xff] }
  0x15   :  { %v364_v26 = vld [vmem:[%s537_s4] ss:$0 sm:$0xff] }
  0x17   :  { %146 = vmatpush.bf16.msra.mxu0 %v341_v4 }
  0x18   :  { %231 = vmatpush.bf16.msra.mxu1 %v349_v5 }
  0x1b   :  { %147 = vmatpush.bf16.msra.mxu0 %v340_v6 }
  0x1c   :  { %232 = vmatpush.bf16.msra.mxu1 %v348_v7 }
  0x1f   :  { %148 = vmatpush.bf16.msra.mxu0 %v339_v8 }
  0x20   :  { %233 = vmatpush.bf16.msra.mxu1 %v347_v13 }
  0x23   :  { %149 = vmatpush.bf16.msra.mxu0 %v338_v9 }
  0x24   :  { %234 = vmatpush.bf16.msra.mxu1 %v346_v14 }
  0x27   :  { %150 = vmatpush.bf16.msra.mxu0 %v337_v10 }
  0x28   :  { %235 = vmatpush.bf16.msra.mxu1 %v345_v15 }
  0x2b   :  { %151 = vmatpush.bf16.msra.mxu0 %v336_v11 }
  0x2c   :  { %236 = vmatpush.bf16.msra.mxu1 %v344_v16 }
  0x2e   :  { %152 = vmatmul.bf16.vlgmr.msra.gmra.mxu0 %v335_v12 }
  0xab   :  { %v153_v17 = vpop.f32.mrf.mxu0 }
  0xac   :  { %v154_v19 = vadd.f32 %v363_v18, %v153_v17 }
  0xae   :  { %v158_v22 = vmax.f32 %v154_v19, 0.0 }
  0xb3   :  { %v155_v20 = vpop.f32.mrf.mxu0 }
  0xb4   :  { %v156_v21 = vadd.f32 %v363_v18, %v155_v20 }
  0xb6   :  { %v159_v23 = vmax.f32 %v156_v21, 0.0 }
  0xb8   :  { %v160_v24 = vpack.c.bf16 %v159_v23, %v158_v22 }
  0xba   :  { %237 = vmatmul.bf16.vlgmr.msra.gmra.mxu1 %v160_v24 }
 0x137   :  { %v238_v25 = vpop.f32.mrf.mxu1 }
 0x138   :  { %v239_v28 = vadd.f32 %v364_v26, %v238_v25 }
 0x13f   :  { %v240_v27 = vpop.f32.mrf.mxu1 }
 0x140   :  { %v241_v29 = vadd.f32 %v364_v26, %v240_v27 }
 0x142   :  { %v355_v30 = vpack.c.bf16 %v241_v29, %v239_v28 }
 0x144   :  { %356 = vst [vmem:[#allocation8] sm:$0xff] %v355_v30  }
 0x145   :  { %259 = dma.vmem_to_hbm [thread:$0]  %s252_s12, 128, %s254_s15, [#allocation4], %s468_s26, %s468_s26, %s469_s27  }
 0x146   :  { %465 = dma.done.wait [#allocation4], 128  }
 0x147   :  { %466 = vsyncadd [#allocation4], 4294967168 }
 0x148   :  { %264 = vsyncpa [#allocation3], 1 }
 0x149   :  { %265 = vsyncpa [#allocation6], 1 }
 0x14a   :  { %266 = vsyncpa [#allocation4], 1 }

</bundles_post_ra>
